<compile_context>
chip_gen: v5e
topology: v5e:2x2
jax: 0.10.0
libtpu: 0.0.40
codegen_flags: <defaults>
</compile_context>

<pallas_src>
import math
from functools import partial

import jax
import jax.numpy as jnp
from jax.experimental import pallas as pl
from jax.experimental.pallas import tpu as pltpu


def _vmem_limit_bytes():
    """Scoped-VMEM limit with ~20% headroom under the physical per-core ceiling."""
    default_cap = 64 * 1024 * 1024
    try:
        cap = getattr(pltpu.get_tpu_info(), "vmem_capacity_bytes", None) or default_cap
    except Exception:
        cap = default_cap
    return int(cap * 0.8)


# ----------------------------------------------------------------------------
# Kernels
# ----------------------------------------------------------------------------
def fused_decoder_kernel(x_ref,
                         wq_ref, bq_ref, wk_ref, bk_ref, wv_ref, bv_ref,
                         wo_ref, bo_ref, g1_ref, be1_ref,
                         w1_ref, b1_ref, w2_ref, b2_ref, g2_ref, be2_ref,
                         y_ref, x_state,
                         *, num_heads, kv_block, layer_major):
    """One decoder layer for one batch element; activations carried in VMEM scratch.

    layer_major=True : grid = (layer, batch)  -> layer weights DMA'd once per layer.
    layer_major=False: grid = (batch, layer)  -> activations resident per batch elem.
    """
    if layer_major:
        l = pl.program_id(0)
        b = pl.program_id(1)
        layer_axis = 0
    else:
        b = 0                      # batch handled purely by the grid / BlockSpecs
        l = pl.program_id(1)
        layer_axis = 1

    @pl.when(l == 0)
    def _():                       # load activations once per batch element
        x_state[b] = x_ref[b]

    x = x_state[b]                 # (S, E) f32
    x_bf = x.astype(jnp.bfloat16)
    S, E = x.shape
    neg = jnp.float32(-1e9)

    # Static KV-tile boundaries for the online-softmax loop.
    kv_tiles = []
    off = 0
    while off < S:
        kv_tiles.append((off, min(kv_block, S - off)))
        off += kv_block

    def masked_scores(qh_bf, kh_f32, start, size):
        k_t = kh_f32[start:start + size].astype(jnp.bfloat16)           # (size, hd)
        s = jax.lax.dot_general(qh_bf, k_t,
                                dimension_numbers=(((1,), (1,)), ((), ())),
                                preferred_element_type=jnp.float32)     # (S, size)
        rows = jax.lax.broadcasted_iota(jnp.int32, (S, size), 0)
        cols = jax.lax.broadcasted_iota(jnp.int32, (S, size), 1) + start
        return jnp.where(rows >= cols, s, neg)                          # causal mask

    # --- multi-head causal self-attention (scale pre-folded into wq/bq) ---
    attn_out = None
    for h in range(num_heads):
        qh = jnp.dot(x_bf, wq_ref[0, h], preferred_element_type=jnp.float32) + bq_ref[0, h]
        kh = jnp.dot(x_bf, wk_ref[0, h], preferred_element_type=jnp.float32) + bk_ref[0, h]
        vh = jnp.dot(x_bf, wv_ref[0, h], preferred_element_type=jnp.float32) + bv_ref[0, h]
        qh_bf = qh.astype(jnp.bfloat16)
        vh_bf = vh.astype(jnp.bfloat16)

        # First KV tile initializes the running stats (diagonal always unmasked).
        st0, sz0 = kv_tiles[0]
        s0 = masked_scores(qh_bf, kh, st0, sz0)
        m = jnp.max(s0, axis=-1, keepdims=True)
        p0 = jnp.exp(s0 - m)
        lsum = jnp.sum(p0, axis=-1, keepdims=True)
        acc = jnp.dot(p0.astype(jnp.bfloat16), vh_bf[st0:st0 + sz0],
                      preferred_element_type=jnp.float32)               # (S, hd)

        for st, sz in kv_tiles[1:]:
            s_t = masked_scores(qh_bf, kh, st, sz)
            m_new = jnp.maximum(m, jnp.max(s_t, axis=-1, keepdims=True))
            alpha = jnp.exp(m - m_new)
            p = jnp.exp(s_t - m_new)
            lsum = alpha * lsum + jnp.sum(p, axis=-1, keepdims=True)
            acc = alpha * acc + jnp.dot(p.astype(jnp.bfloat16), vh_bf[st:st + sz],
                                        preferred_element_type=jnp.float32)
            m = m_new

        oh = acc * pl.reciprocal(lsum, approx=True)                     # (S, hd)
        proj = jnp.dot(oh.astype(jnp.bfloat16), wo_ref[0, h],
                       preferred_element_type=jnp.float32)              # (S, E)
        attn_out = proj if attn_out is None else attn_out + proj
    attn_out = attn_out + bo_ref[0]

    def layernorm(z, g, bb):       # f32 statistics, eps = 1e-5 (PyTorch default)
        mu = jnp.mean(z, axis=-1, keepdims=True)
        zc = z - mu
        var = jnp.mean(zc * zc, axis=-1, keepdims=True)
        return zc * jax.lax.rsqrt(var + 1e-5) * g + bb

    # residual + norm1  (dropout = identity in eval mode)
    x1 = layernorm(x + attn_out, g1_ref[0], be1_ref[0])

    # --- feed-forward: Linear(E->4E) -> ReLU -> Linear(4E->E) ---
    h1 = jnp.dot(x1.astype(jnp.bfloat16), w1_ref[0],
                 preferred_element_type=jnp.float32) + b1_ref[0]
    h1 = jnp.maximum(h1, 0.0)
    ff = jnp.dot(h1.astype(jnp.bfloat16), w2_ref[0],
                 preferred_element_type=jnp.float32) + b2_ref[0]

    # residual + norm2
    x2 = layernorm(x1 + ff, g2_ref[0], be2_ref[0])
    x_state[b] = x2

    @pl.when(l == pl.num_programs(layer_axis) - 1)
    def _():                       # write back (bf16) only after the last layer
        y_ref[b] = x2.astype(y_ref.dtype)


def lm_head_kernel(x_ref, w_ref, b_ref, o_ref):
    """LM head tile: x (tm, E) bf16 @ w (E, tv) bf16 + b -> o (tm, tv) f32."""
    o_ref[...] = (jnp.dot(x_ref[...], w_ref[...],
                          preferred_element_type=jnp.float32) + b_ref[...])


# ----------------------------------------------------------------------------
# Wrappers (pallas_call plumbing)
# ----------------------------------------------------------------------------
_PARAM_ORDER = ("wq", "bq", "wk", "bk", "wv", "bv", "wo", "bo",
                "g1", "be1", "w1", "b1", "w2", "b2", "g2", "be2")


def stack_layer_params(layers, num_heads):
    """Stack per-layer params with a leading layer axis; pre-split Q/K/V/O per head,
    fold 1/sqrt(head_dim) into wq/bq, and cast matmul weights to bf16 (host-side)."""
    E = layers[0]["wq"].shape[0]
    hd = E // num_heads
    scale = 1.0 / math.sqrt(hd)

    def per_head_w(w, s=1.0):   # (E, E) -> (H, E, hd)
        return jnp.transpose(w.reshape(E, num_heads, hd) * s, (1, 0, 2)).astype(jnp.bfloat16)

    def per_head_b(b, s=1.0):   # (1, E) -> (H, 1, hd)
        return jnp.transpose(b.reshape(1, num_heads, hd) * s, (1, 0, 2)).astype(jnp.float32)

    def out_head_w(w):          # (E, E) -> (H, hd, E)
        return w.reshape(num_heads, hd, E).astype(jnp.bfloat16)

    ident = lambda a: a.astype(jnp.float32)
    bf16 = lambda a: a.astype(jnp.bfloat16)
    return {
        "wq": jnp.stack([per_head_w(lp["wq"], scale) for lp in layers]),
        "bq": jnp.stack([per_head_b(lp["bq"], scale) for lp in layers]),
        "wk": jnp.stack([per_head_w(lp["wk"]) for lp in layers]),
        "bk": jnp.stack([per_head_b(lp["bk"]) for lp in layers]),
        "wv": jnp.stack([per_head_w(lp["wv"]) for lp in layers]),
        "bv": jnp.stack([per_head_b(lp["bv"]) for lp in layers]),
        "wo": jnp.stack([out_head_w(lp["wo"]) for lp in layers]),
        "bo": jnp.stack([ident(lp["bo"]) for lp in layers]),
        "g1": jnp.stack([ident(lp["g1"]) for lp in layers]),
        "be1": jnp.stack([ident(lp["be1"]) for lp in layers]),
        "w1": jnp.stack([bf16(lp["w1"]) for lp in layers]),
        "b1": jnp.stack([ident(lp["b1"]) for lp in layers]),
        "w2": jnp.stack([bf16(lp["w2"]) for lp in layers]),
        "b2": jnp.stack([ident(lp["b2"]) for lp in layers]),
        "g2": jnp.stack([ident(lp["g2"]) for lp in layers]),
        "be2": jnp.stack([ident(lp["be2"]) for lp in layers]),
    }


def run_decoder_stack(x, stacked, num_heads, *, kv_block, layer_major=None):
    B, S, E = x.shape
    L = stacked["wq"].shape[0]
    if layer_major is None:
        # Layer-major (grid = (L, B)) fetches each layer's weights once total instead
        # of once per batch element, but needs all B activations resident in VMEM.
        layer_major = (B > 1) and (B * S * E * 4) <= (4 << 20)

    params = [stacked[n] for n in _PARAM_ORDER]

    def w_spec(p):
        block = (1,) + p.shape[1:]
        zeros = (0,) * (len(p.shape) - 1)
        if layer_major:
            return pl.BlockSpec(block, lambda l, b, _z=zeros: (l,) + _z)
        return pl.BlockSpec(block, lambda b, l, _z=zeros: (l,) + _z)

    if layer_major:
        grid = (L, B)
        x_spec = pl.BlockSpec((B, S, E), lambda l, b: (0, 0, 0))    # fetched once
        y_spec = pl.BlockSpec((B, S, E), lambda l, b: (0, 0, 0))    # flushed once
        n_state = B
        # Layer carry is sequential; keeping the batch axis innermost keeps each
        # layer's weights VMEM-resident across it, so both axes stay "arbitrary".
        dims = ("arbitrary", "arbitrary")
    else:
        grid = (B, L)
        x_spec = pl.BlockSpec((1, S, E), lambda b, l: (b, 0, 0))
        y_spec = pl.BlockSpec((1, S, E), lambda b, l: (b, 0, 0))
        n_state = 1
        dims = ("parallel", "arbitrary")

    return pl.pallas_call(
        partial(fused_decoder_kernel, num_heads=num_heads,
                kv_block=kv_block, layer_major=layer_major),
        out_shape=jax.ShapeDtypeStruct((B, S, E), jnp.bfloat16),
        grid=grid,
        in_specs=[x_spec] + [w_spec(p) for p in params],
        out_specs=y_spec,
        scratch_shapes=[pltpu.VMEM((n_state, S, E), jnp.float32)],
        compiler_params=pltpu.CompilerParams(
            dimension_semantics=dims,
            vmem_limit_bytes=_vmem_limit_bytes()),
    )(x, *params)


def run_lm_head(x_bf16, w, b):
    """Tiled LM head on flattened (B*S, E) bf16 activations; weights streamed once."""
    B, S, E = x_bf16.shape
    V = w.shape[1]
    M = B * S
    x2d = x_bf16.reshape(M, E)

    tv = min(1024, pl.cdiv(V, 128) * 128)      # lane-dense vocab tile (up to 1024)
    V_pad = pl.cdiv(V, tv) * tv
    if M <= 512:
        tm, M_pad = M, M
    else:
        tm = 512
        M_pad = pl.cdiv(M, tm) * tm
    if M_pad != M:
        x2d = jnp.pad(x2d, ((0, M_pad - M), (0, 0)))

    w_pad = jnp.pad(w, ((0, 0), (0, V_pad - V))).astype(jnp.bfloat16)
    b_pad = jnp.pad(b, ((0, 0), (0, V_pad - V))).astype(jnp.float32)

    # grid = (vocab tile, m tile) with m innermost: the (E, tv) weight tile stays
    # VMEM-resident across the inner axis, so the E x V matrix is DMA'd exactly once.
    out = pl.pallas_call(
        lm_head_kernel,
        out_shape=jax.ShapeDtypeStruct((M_pad, V_pad), jnp.float32),
        grid=(V_pad // tv, M_pad // tm),
        in_specs=[pl.BlockSpec((tm, E), lambda v, m: (m, 0)),
                  pl.BlockSpec((E, tv), lambda v, m: (0, v)),
                  pl.BlockSpec((1, tv), lambda v, m: (0, v))],
        out_specs=pl.BlockSpec((tm, tv), lambda v, m: (m, v)),
        compiler_params=pltpu.CompilerParams(
            dimension_semantics=("parallel", "parallel"),
            vmem_limit_bytes=_vmem_limit_bytes()),
    )(x2d, w_pad, b_pad)
    return out[:M, :V].reshape(B, S, V)


def transformer_decoder_lm(tokens, params, num_heads, *, kv_block=None, layer_major=None):
    """Forward pass (targets=None branch): returns logits (B, S, V)."""
    B, S = tokens.shape
    x = params["tok_emb"][tokens] + params["pos_emb"][jnp.arange(S)][None, :, :]
    # TODO(synk): nn.Dropout layers are identity here (eval-mode semantics).
    if kv_block is None:
        kv_block = min(S, 512)
    stacked = stack_layer_params(params["layers"], num_heads)
    x = run_decoder_stack(x, stacked, num_heads, kv_block=kv_block, layer_major=layer_major)
    return run_lm_head(x, params["lm_w"], params["lm_b"])


# ----------------------------------------------------------------------------
# Pure-JAX reference with the SAME bf16-before-matmul numerics (sanity check)
# ----------------------------------------------------------------------------
def _ref_layernorm(z, g, b):
    mu = jnp.mean(z, axis=-1, keepdims=True)
    var = jnp.mean((z - mu) ** 2, axis=-1, keepdims=True)
    return (z - mu) * jax.lax.rsqrt(var + 1e-5) * g + b


def ref_forward(tokens, params, num_heads):
    bf = jnp.bfloat16
    dot = lambda a, w: jnp.matmul(a.astype(bf), w.astype(bf),
                                  preferred_element_type=jnp.float32)
    B, S = tokens.shape
    x = params["tok_emb"][tokens] + params["pos_emb"][jnp.arange(S)][None, :, :]
    E = x.shape[-1]
    hd = E // num_heads
    causal = jnp.tril(jnp.ones((S, S)))
    for lp in params["layers"]:
        q = dot(x, lp["wq"]) + lp["bq"]
        k = dot(x, lp["wk"]) + lp["bk"]
        v = dot(x, lp["wv"]) + lp["bv"]
        q = q.reshape(B, S, num_heads, hd).transpose(0, 2, 1, 3)
        k = k.reshape(B, S, num_heads, hd).transpose(0, 2, 1, 3)
        v = v.reshape(B, S, num_heads, hd).transpose(0, 2, 1, 3)
        scores = jnp.einsum('bhqd,bhkd->bhqk', q.astype(bf), k.astype(bf),
                            preferred_element_type=jnp.float32) / math.sqrt(hd)
        scores = jnp.where(causal[None, None] == 0, -1e9, scores)
        attn = jax.nn.softmax(scores, axis=-1)
        o = jnp.einsum('bhqk,bhkd->bhqd', attn.astype(bf), v.astype(bf),
                       preferred_element_type=jnp.float32)
        o = o.transpose(0, 2, 1, 3).reshape(B, S, E)
        o = dot(o, lp["wo"]) + lp["bo"]
        x = _ref_layernorm(x + o, lp["g1"], lp["be1"])
        h = jnp.maximum(dot(x, lp["w1"]) + lp["b1"], 0.0)
        ff = dot(h, lp["w2"]) + lp["b2"]
        x = _ref_layernorm(x + ff, lp["g2"], lp["be2"])
    return dot(x, params["lm_w"]) + params["lm_b"]


# ----------------------------------------------------------------------------
# Deterministic parameter construction
# ----------------------------------------------------------------------------
def make_params(key, vocab_size, embed_size, num_layers, max_length):
    E, H4 = embed_size, 4 * embed_size
    keys = iter(jax.random.split(key, 8 + 8 * num_layers))

    def w(shape):
        return (0.02 * jax.random.normal(next(keys), shape)).astype(jnp.float32)

    params = {
        "tok_emb": w((vocab_size, E)),
        "pos_emb": w((max_length, E)),
        "lm_w": w((E, vocab_size)),
        "lm_b": jnp.zeros((1, vocab_size), jnp.float32),
        "layers": [],
    }
    for _ in range(num_layers):
        lp = {
            "wq": w((E, E)), "bq": jnp.zeros((1, E), jnp.float32),
            "wk": w((E, E)), "bk": jnp.zeros((1, E), jnp.float32),
            "wv": w((E, E)), "bv": jnp.zeros((1, E), jnp.float32),
            "wo": w((E, E)), "bo": jnp.zeros((1, E), jnp.float32),
            "g1": jnp.ones((1, E), jnp.float32), "be1": jnp.zeros((1, E), jnp.float32),
            "w1": w((E, H4)), "b1": jnp.zeros((1, H4), jnp.float32),
            "w2": w((H4, E)), "b2": jnp.zeros((1, E), jnp.float32),
            "g2": jnp.ones((1, E), jnp.float32), "be2": jnp.zeros((1, E), jnp.float32),
        }
        params["layers"].append(lp)
    return params


# ----------------------------------------------------------------------------
if __name__ == "__main__":
    vocab_size, embed_size, num_heads, num_layers, max_length = 97, 32, 2, 2, 16
    B, S = 2, 8

    key = jax.random.PRNGKey(0)
    k_params, k_tok = jax.random.split(key)
    params = make_params(k_params, vocab_size, embed_size, num_layers, max_length)
    tokens = jax.random.randint(k_tok, (B, S), 0, vocab_size, dtype=jnp.int32)

    ref = ref_forward(tokens, params, num_heads)

    # Default path: layer-major grid (weights DMA'd once per layer), single KV tile.
    logits = jax.block_until_ready(transformer_decoder_lm(tokens, params, num_heads))
    assert logits.shape == (B, S, vocab_size)
    # Tolerance covers bf16-matmul rounding + approx-reciprocal softmax divergence
    # vs. the (also bf16-input) f32-accumulating reference.
    assert jnp.allclose(logits, ref, rtol=1e-2, atol=1e-2), "mismatch (layer-major path)"

    # Alternate path: batch-major grid + multi-tile online-softmax attention.
    logits2 = jax.block_until_ready(
        transformer_decoder_lm(tokens, params, num_heads, kv_block=4, layer_major=False))
    assert jnp.allclose(logits2, ref, rtol=1e-2, atol=1e-2), "mismatch (flash/batch-major path)"

    print("KERNEL_OK")
</pallas_src>

<mosaic_0001>
module attributes {stable_mosaic.version = 11 : i64} {
  func.func @fused_decoder_kernel(%arg0: i32, %arg1: i32, %arg2: memref<2x8x32xf32, #tpu.memory_space<vmem>>, %arg3: memref<1x2x32x16xbf16, #tpu.memory_space<vmem>>, %arg4: memref<1x2x1x16xf32, #tpu.memory_space<vmem>>, %arg5: memref<1x2x32x16xbf16, #tpu.memory_space<vmem>>, %arg6: memref<1x2x1x16xf32, #tpu.memory_space<vmem>>, %arg7: memref<1x2x32x16xbf16, #tpu.memory_space<vmem>>, %arg8: memref<1x2x1x16xf32, #tpu.memory_space<vmem>>, %arg9: memref<1x2x16x32xbf16, #tpu.memory_space<vmem>>, %arg10: memref<1x1x32xf32, #tpu.memory_space<vmem>>, %arg11: memref<1x1x32xf32, #tpu.memory_space<vmem>>, %arg12: memref<1x1x32xf32, #tpu.memory_space<vmem>>, %arg13: memref<1x32x128xbf16, #tpu.memory_space<vmem>>, %arg14: memref<1x1x128xf32, #tpu.memory_space<vmem>>, %arg15: memref<1x128x32xbf16, #tpu.memory_space<vmem>>, %arg16: memref<1x1x32xf32, #tpu.memory_space<vmem>>, %arg17: memref<1x1x32xf32, #tpu.memory_space<vmem>>, %arg18: memref<1x1x32xf32, #tpu.memory_space<vmem>>, %arg19: memref<2x8x32xbf16, #tpu.memory_space<vmem>>, %arg20: memref<2x8x32xf32, #tpu.memory_space<vmem>>) attributes {dimension_semantics = [#tpu.dimension_semantics<arbitrary>, #tpu.dimension_semantics<arbitrary>], iteration_bounds = array<i64: 2, 2>, scalar_prefetch = 0 : i64, scratch_operands = 1 : i64, tpu.core_type = #tpu.core_type<tc>, window_params = [{pipeline_mode = #tpu.pipeline_mode<synchronous>, transform_indices = @transform_0, window_bounds = array<i64: 2, 8, 32>}, {transform_indices = @transform_1, window_bounds = array<i64: 1, 2, 32, 16>}, {transform_indices = @transform_2, window_bounds = array<i64: 1, 2, 1, 16>}, {transform_indices = @transform_3, window_bounds = array<i64: 1, 2, 32, 16>}, {transform_indices = @transform_4, window_bounds = array<i64: 1, 2, 1, 16>}, {transform_indices = @transform_5, window_bounds = array<i64: 1, 2, 32, 16>}, {transform_indices = @transform_6, window_bounds = array<i64: 1, 2, 1, 16>}, {transform_indices = @transform_7, window_bounds = array<i64: 1, 2, 16, 32>}, {transform_indices = @transform_8, window_bounds = array<i64: 1, 1, 32>}, {transform_indices = @transform_9, window_bounds = array<i64: 1, 1, 32>}, {transform_indices = @transform_10, window_bounds = array<i64: 1, 1, 32>}, {transform_indices = @transform_11, window_bounds = array<i64: 1, 32, 128>}, {transform_indices = @transform_12, window_bounds = array<i64: 1, 1, 128>}, {transform_indices = @transform_13, window_bounds = array<i64: 1, 128, 32>}, {transform_indices = @transform_14, window_bounds = array<i64: 1, 1, 32>}, {transform_indices = @transform_15, window_bounds = array<i64: 1, 1, 32>}, {transform_indices = @transform_16, window_bounds = array<i64: 1, 1, 32>}, {pipeline_mode = #tpu.pipeline_mode<synchronous>, transform_indices = @transform_17, window_bounds = array<i64: 2, 8, 32>}]} {
    %c0_i32 = arith.constant 0 : i32
    %0 = arith.cmpi eq, %arg0, %c0_i32 : i32
    %1 = arith.extui %0 : i1 to i32
    %c0_i32_0 = arith.constant 0 : i32
    %2 = arith.cmpi ne, %1, %c0_i32_0 : i32
    scf.if %2 {
      %183 = arith.index_cast %arg1 : i32 to index
      %c0_119 = arith.constant 0 : index
      %c0_120 = arith.constant 0 : index
      %184 = vector.load %arg2[%183, %c0_119, %c0_120] : memref<2x8x32xf32, #tpu.memory_space<vmem>>, vector<1x8x32xf32>
      %185 = vector.shape_cast %184 : vector<1x8x32xf32> to vector<8x32xf32>
      %186 = arith.index_cast %arg1 : i32 to index
      %c0_121 = arith.constant 0 : index
      %c0_122 = arith.constant 0 : index
      %187 = vector.load %arg20[%186, %c0_121, %c0_122] : memref<2x8x32xf32, #tpu.memory_space<vmem>>, vector<1x8x32xf32>
      %188 = vector.shape_cast %187 : vector<1x8x32xf32> to vector<8x32xf32>
      %189 = vector.shape_cast %185 : vector<8x32xf32> to vector<1x8x32xf32>
      tpu.vector_store %arg20[%186, %c0_121, %c0_122], %189 {strides = array<i32>} : memref<2x8x32xf32, #tpu.memory_space<vmem>>, vector<1x8x32xf32>,
    } else {
    }
    %3 = arith.index_cast %arg1 : i32 to index
    %c0 = arith.constant 0 : index
    %c0_1 = arith.constant 0 : index
    %4 = vector.load %arg20[%3, %c0, %c0_1] : memref<2x8x32xf32, #tpu.memory_space<vmem>>, vector<1x8x32xf32>
    %5 = vector.shape_cast %4 : vector<1x8x32xf32> to vector<8x32xf32>
    %6 = arith.truncf %5 : vector<8x32xf32> to vector<8x32xbf16>
    %c0_2 = arith.constant 0 : index
    %c0_3 = arith.constant 0 : index
    %c0_4 = arith.constant 0 : index
    %c0_5 = arith.constant 0 : index
    %7 = vector.load %arg3[%c0_2, %c0_3, %c0_4, %c0_5] : memref<1x2x32x16xbf16, #tpu.memory_space<vmem>>, vector<1x1x32x16xbf16>
    %8 = vector.shape_cast %7 : vector<1x1x32x16xbf16> to vector<32x16xbf16>
    %cst = arith.constant dense<0.000000e+00> : vector<8x16xf32>
    %9 = tpu.matmul %6, %8, %cst {dimension_numbers = #tpu.dot_dimension_numbers<[1], [0], [0], [1], [0, 0, 1, 1], [], []>} : vector<8x32xbf16>, vector<32x16xbf16>, vector<8x16xf32> -> vector<8x16xf32>
    %c0_6 = arith.constant 0 : index
    %c0_7 = arith.constant 0 : index
    %c0_8 = arith.constant 0 : index
    %c0_9 = arith.constant 0 : index
    %10 = vector.load %arg4[%c0_6, %c0_7, %c0_8, %c0_9] : memref<1x2x1x16xf32, #tpu.memory_space<vmem>>, vector<1x1x1x16xf32>
    %11 = vector.shape_cast %10 : vector<1x1x1x16xf32> to vector<1x16xf32>
    %12 = vector.broadcast %11 : vector<1x16xf32> to vector<8x16xf32>
    %13 = arith.addf %9, %12 : vector<8x16xf32>
    %c0_10 = arith.constant 0 : index
    %c0_11 = arith.constant 0 : index
    %c0_12 = arith.constant 0 : index
    %c0_13 = arith.constant 0 : index
    %14 = vector.load %arg5[%c0_10, %c0_11, %c0_12, %c0_13] : memref<1x2x32x16xbf16, #tpu.memory_space<vmem>>, vector<1x1x32x16xbf16>
    %15 = vector.shape_cast %14 : vector<1x1x32x16xbf16> to vector<32x16xbf16>
    %cst_14 = arith.constant dense<0.000000e+00> : vector<8x16xf32>
    %16 = tpu.matmul %6, %15, %cst_14 {dimension_numbers = #tpu.dot_dimension_numbers<[1], [0], [0], [1], [0, 0, 1, 1], [], []>} : vector<8x32xbf16>, vector<32x16xbf16>, vector<8x16xf32> -> vector<8x16xf32>
    %c0_15 = arith.constant 0 : index
    %c0_16 = arith.constant 0 : index
    %c0_17 = arith.constant 0 : index
    %c0_18 = arith.constant 0 : index
    %17 = vector.load %arg6[%c0_15, %c0_16, %c0_17, %c0_18] : memref<1x2x1x16xf32, #tpu.memory_space<vmem>>, vector<1x1x1x16xf32>
    %18 = vector.shape_cast %17 : vector<1x1x1x16xf32> to vector<1x16xf32>
    %19 = vector.broadcast %18 : vector<1x16xf32> to vector<8x16xf32>
    %20 = arith.addf %16, %19 : vector<8x16xf32>
    %c0_19 = arith.constant 0 : index
    %c0_20 = arith.constant 0 : index
    %c0_21 = arith.constant 0 : index
    %c0_22 = arith.constant 0 : index
    %21 = vector.load %arg7[%c0_19, %c0_20, %c0_21, %c0_22] : memref<1x2x32x16xbf16, #tpu.memory_space<vmem>>, vector<1x1x32x16xbf16>
    %22 = vector.shape_cast %21 : vector<1x1x32x16xbf16> to vector<32x16xbf16>
    %cst_23 = arith.constant dense<0.000000e+00> : vector<8x16xf32>
    %23 = tpu.matmul %6, %22, %cst_23 {dimension_numbers = #tpu.dot_dimension_numbers<[1], [0], [0], [1], [0, 0, 1, 1], [], []>} : vector<8x32xbf16>, vector<32x16xbf16>, vector<8x16xf32> -> vector<8x16xf32>
    %c0_24 = arith.constant 0 : index
    %c0_25 = arith.constant 0 : index
    %c0_26 = arith.constant 0 : index
    %c0_27 = arith.constant 0 : index
    %24 = vector.load %arg8[%c0_24, %c0_25, %c0_26, %c0_27] : memref<1x2x1x16xf32, #tpu.memory_space<vmem>>, vector<1x1x1x16xf32>
    %25 = vector.shape_cast %24 : vector<1x1x1x16xf32> to vector<1x16xf32>
    %26 = vector.broadcast %25 : vector<1x16xf32> to vector<8x16xf32>
    %27 = arith.addf %23, %26 : vector<8x16xf32>
    %28 = arith.truncf %13 : vector<8x16xf32> to vector<8x16xbf16>
    %29 = arith.truncf %27 : vector<8x16xf32> to vector<8x16xbf16>
    %30 = arith.truncf %20 : vector<8x16xf32> to vector<8x16xbf16>
    %cst_28 = arith.constant dense<0.000000e+00> : vector<8x8xf32>
    %31 = tpu.matmul %28, %30, %cst_28 {dimension_numbers = #tpu.dot_dimension_numbers<[1], [1], [0], [0], [0, 0, 1, 0], [], []>} : vector<8x16xbf16>, vector<8x16xbf16>, vector<8x8xf32> -> vector<8x8xf32>
    %32 = tpu.iota {dimensions = array<i32: 0>} : vector<8x8xi32>
    %33 = tpu.iota {dimensions = array<i32: 1>} : vector<8x8xi32>
    %c0_i32_29 = arith.constant 0 : i32
    %34 = vector.broadcast %c0_i32_29 : i32 to vector<8x8xi32>
    %35 = arith.addi %33, %34 : vector<8x8xi32>
    %36 = arith.cmpi sge, %32, %35 : vector<8x8xi32>
    %cst_30 = arith.constant -1.000000e+09 : f32
    %37 = vector.broadcast %cst_30 : f32 to vector<8x8xf32>
    %38 = arith.select %36, %31, %37 : vector<8x8xi1>, vector<8x8xf32>
    %cst_31 = arith.constant dense<0xFF800000> : vector<8xf32>
    %39 = vector.multi_reduction <maximumf>, %38, %cst_31 [1] : vector<8x8xf32> to vector<8xf32>
    %40 = vector.shape_cast %39 : vector<8xf32> to vector<8x1xf32>
    %41 = vector.broadcast %40 : vector<8x1xf32> to vector<8x8xf32>
    %42 = arith.subf %38, %41 : vector<8x8xf32>
    %43 = math.exp %42 : vector<8x8xf32>
    %cst_32 = arith.constant dense<0.000000e+00> : vector<8xf32>
    %44 = vector.multi_reduction <add>, %43, %cst_32 [1] : vector<8x8xf32> to vector<8xf32>
    %45 = vector.shape_cast %44 : vector<8xf32> to vector<8x1xf32>
    %46 = arith.truncf %43 : vector<8x8xf32> to vector<8x8xbf16>
    %cst_33 = arith.constant dense<0.000000e+00> : vector<8x16xf32>
    %47 = tpu.matmul %46, %29, %cst_33 {dimension_numbers = #tpu.dot_dimension_numbers<[1], [0], [0], [1], [0, 0, 1, 1], [], []>} : vector<8x8xbf16>, vector<8x16xbf16>, vector<8x16xf32> -> vector<8x16xf32>
    %48 = tpu.reciprocal %45 {approx = true} : vector<8x1xf32> -> vector<8x1xf32>
    %49 = vector.broadcast %48 : vector<8x1xf32> to vector<8x16xf32>
    %50 = arith.mulf %47, %49 : vector<8x16xf32>
    %51 = arith.truncf %50 : vector<8x16xf32> to vector<8x16xbf16>
    %c0_34 = arith.constant 0 : index
    %c0_35 = arith.constant 0 : index
    %c0_36 = arith.constant 0 : index
    %c0_37 = arith.constant 0 : index
    %52 = vector.load %arg9[%c0_34, %c0_35, %c0_36, %c0_37] : memref<1x2x16x32xbf16, #tpu.memory_space<vmem>>, vector<1x1x16x32xbf16>
    %53 = vector.shape_cast %52 : vector<1x1x16x32xbf16> to vector<16x32xbf16>
    %cst_38 = arith.constant dense<0.000000e+00> : vector<8x32xf32>
    %54 = tpu.matmul %51, %53, %cst_38 {dimension_numbers = #tpu.dot_dimension_numbers<[1], [0], [0], [1], [0, 0, 1, 1], [], []>} : vector<8x16xbf16>, vector<16x32xbf16>, vector<8x32xf32> -> vector<8x32xf32>
    %c0_39 = arith.constant 0 : index
    %c1 = arith.constant 1 : index
    %c0_40 = arith.constant 0 : index
    %c0_41 = arith.constant 0 : index
    %55 = vector.load %arg3[%c0_39, %c1, %c0_40, %c0_41] : memref<1x2x32x16xbf16, #tpu.memory_space<vmem>>, vector<1x1x32x16xbf16>
    %56 = vector.shape_cast %55 : vector<1x1x32x16xbf16> to vector<32x16xbf16>
    %cst_42 = arith.constant dense<0.000000e+00> : vector<8x16xf32>
    %57 = tpu.matmul %6, %56, %cst_42 {dimension_numbers = #tpu.dot_dimension_numbers<[1], [0], [0], [1], [0, 0, 1, 1], [], []>} : vector<8x32xbf16>, vector<32x16xbf16>, vector<8x16xf32> -> vector<8x16xf32>
    %c0_43 = arith.constant 0 : index
    %c1_44 = arith.constant 1 : index
    %c0_45 = arith.constant 0 : index
    %c0_46 = arith.constant 0 : index
    %58 = vector.load %arg4[%c0_43, %c1_44, %c0_45, %c0_46] : memref<1x2x1x16xf32, #tpu.memory_space<vmem>>, vector<1x1x1x16xf32>
    %59 = vector.shape_cast %58 : vector<1x1x1x16xf32> to vector<1x16xf32>
    %60 = vector.broadcast %59 : vector<1x16xf32> to vector<8x16xf32>
    %61 = arith.addf %57, %60 : vector<8x16xf32>
    %c0_47 = arith.constant 0 : index
    %c1_48 = arith.constant 1 : index
    %c0_49 = arith.constant 0 : index
    %c0_50 = arith.constant 0 : index
    %62 = vector.load %arg5[%c0_47, %c1_48, %c0_49, %c0_50] : memref<1x2x32x16xbf16, #tpu.memory_space<vmem>>, vector<1x1x32x16xbf16>
    %63 = vector.shape_cast %62 : vector<1x1x32x16xbf16> to vector<32x16xbf16>
    %cst_51 = arith.constant dense<0.000000e+00> : vector<8x16xf32>
    %64 = tpu.matmul %6, %63, %cst_51 {dimension_numbers = #tpu.dot_dimension_numbers<[1], [0], [0], [1], [0, 0, 1, 1], [], []>} : vector<8x32xbf16>, vector<32x16xbf16>, vector<8x16xf32> -> vector<8x16xf32>
    %c0_52 = arith.constant 0 : index
    %c1_53 = arith.constant 1 : index
    %c0_54 = arith.constant 0 : index
    %c0_55 = arith.constant 0 : index
    %65 = vector.load %arg6[%c0_52, %c1_53, %c0_54, %c0_55] : memref<1x2x1x16xf32, #tpu.memory_space<vmem>>, vector<1x1x1x16xf32>
    %66 = vector.shape_cast %65 : vector<1x1x1x16xf32> to vector<1x16xf32>
    %67 = vector.broadcast %66 : vector<1x16xf32> to vector<8x16xf32>
    %68 = arith.addf %64, %67 : vector<8x16xf32>
    %c0_56 = arith.constant 0 : index
    %c1_57 = arith.constant 1 : index
    %c0_58 = arith.constant 0 : index
    %c0_59 = arith.constant 0 : index
    %69 = vector.load %arg7[%c0_56, %c1_57, %c0_58, %c0_59] : memref<1x2x32x16xbf16, #tpu.memory_space<vmem>>, vector<1x1x32x16xbf16>
    %70 = vector.shape_cast %69 : vector<1x1x32x16xbf16> to vector<32x16xbf16>
    %cst_60 = arith.constant dense<0.000000e+00> : vector<8x16xf32>
    %71 = tpu.matmul %6, %70, %cst_60 {dimension_numbers = #tpu.dot_dimension_numbers<[1], [0], [0], [1], [0, 0, 1, 1], [], []>} : vector<8x32xbf16>, vector<32x16xbf16>, vector<8x16xf32> -> vector<8x16xf32>
    %c0_61 = arith.constant 0 : index
    %c1_62 = arith.constant 1 : index
    %c0_63 = arith.constant 0 : index
    %c0_64 = arith.constant 0 : index
    %72 = vector.load %arg8[%c0_61, %c1_62, %c0_63, %c0_64] : memref<1x2x1x16xf32, #tpu.memory_space<vmem>>, vector<1x1x1x16xf32>
    %73 = vector.shape_cast %72 : vector<1x1x1x16xf32> to vector<1x16xf32>
    %74 = vector.broadcast %73 : vector<1x16xf32> to vector<8x16xf32>
    %75 = arith.addf %71, %74 : vector<8x16xf32>
    %76 = arith.truncf %61 : vector<8x16xf32> to vector<8x16xbf16>
    %77 = arith.truncf %75 : vector<8x16xf32> to vector<8x16xbf16>
    %78 = arith.truncf %68 : vector<8x16xf32> to vector<8x16xbf16>
    %cst_65 = arith.constant dense<0.000000e+00> : vector<8x8xf32>
    %79 = tpu.matmul %76, %78, %cst_65 {dimension_numbers = #tpu.dot_dimension_numbers<[1], [1], [0], [0], [0, 0, 1, 0], [], []>} : vector<8x16xbf16>, vector<8x16xbf16>, vector<8x8xf32> -> vector<8x8xf32>
    %80 = tpu.iota {dimensions = array<i32: 0>} : vector<8x8xi32>
    %81 = tpu.iota {dimensions = array<i32: 1>} : vector<8x8xi32>
    %c0_i32_66 = arith.constant 0 : i32
    %82 = vector.broadcast %c0_i32_66 : i32 to vector<8x8xi32>
    %83 = arith.addi %81, %82 : vector<8x8xi32>
    %84 = arith.cmpi sge, %80, %83 : vector<8x8xi32>
    %cst_67 = arith.constant -1.000000e+09 : f32
    %85 = vector.broadcast %cst_67 : f32 to vector<8x8xf32>
    %86 = arith.select %84, %79, %85 : vector<8x8xi1>, vector<8x8xf32>
    %cst_68 = arith.constant dense<0xFF800000> : vector<8xf32>
    %87 = vector.multi_reduction <maximumf>, %86, %cst_68 [1] : vector<8x8xf32> to vector<8xf32>
    %88 = vector.shape_cast %87 : vector<8xf32> to vector<8x1xf32>
    %89 = vector.broadcast %88 : vector<8x1xf32> to vector<8x8xf32>
    %90 = arith.subf %86, %89 : vector<8x8xf32>
    %91 = math.exp %90 : vector<8x8xf32>
    %cst_69 = arith.constant dense<0.000000e+00> : vector<8xf32>
    %92 = vector.multi_reduction <add>, %91, %cst_69 [1] : vector<8x8xf32> to vector<8xf32>
    %93 = vector.shape_cast %92 : vector<8xf32> to vector<8x1xf32>
    %94 = arith.truncf %91 : vector<8x8xf32> to vector<8x8xbf16>
    %cst_70 = arith.constant dense<0.000000e+00> : vector<8x16xf32>
    %95 = tpu.matmul %94, %77, %cst_70 {dimension_numbers = #tpu.dot_dimension_numbers<[1], [0], [0], [1], [0, 0, 1, 1], [], []>} : vector<8x8xbf16>, vector<8x16xbf16>, vector<8x16xf32> -> vector<8x16xf32>
    %96 = tpu.reciprocal %93 {approx = true} : vector<8x1xf32> -> vector<8x1xf32>
    %97 = vector.broadcast %96 : vector<8x1xf32> to vector<8x16xf32>
    %98 = arith.mulf %95, %97 : vector<8x16xf32>
    %99 = arith.truncf %98 : vector<8x16xf32> to vector<8x16xbf16>
    %c0_71 = arith.constant 0 : index
    %c1_72 = arith.constant 1 : index
    %c0_73 = arith.constant 0 : index
    %c0_74 = arith.constant 0 : index
    %100 = vector.load %arg9[%c0_71, %c1_72, %c0_73, %c0_74] : memref<1x2x16x32xbf16, #tpu.memory_space<vmem>>, vector<1x1x16x32xbf16>
    %101 = vector.shape_cast %100 : vector<1x1x16x32xbf16> to vector<16x32xbf16>
    %cst_75 = arith.constant dense<0.000000e+00> : vector<8x32xf32>
    %102 = tpu.matmul %99, %101, %cst_75 {dimension_numbers = #tpu.dot_dimension_numbers<[1], [0], [0], [1], [0, 0, 1, 1], [], []>} : vector<8x16xbf16>, vector<16x32xbf16>, vector<8x32xf32> -> vector<8x32xf32>
    %103 = arith.addf %54, %102 : vector<8x32xf32>
    %c0_76 = arith.constant 0 : index
    %c0_77 = arith.constant 0 : index
    %c0_78 = arith.constant 0 : index
    %104 = vector.load %arg10[%c0_76, %c0_77, %c0_78] : memref<1x1x32xf32, #tpu.memory_space<vmem>>, vector<1x1x32xf32>
    %105 = vector.shape_cast %104 : vector<1x1x32xf32> to vector<1x32xf32>
    %106 = vector.broadcast %105 : vector<1x32xf32> to vector<8x32xf32>
    %107 = arith.addf %103, %106 : vector<8x32xf32>
    %108 = arith.addf %5, %107 : vector<8x32xf32>
    %c0_79 = arith.constant 0 : index
    %c0_80 = arith.constant 0 : index
    %c0_81 = arith.constant 0 : index
    %109 = vector.load %arg11[%c0_79, %c0_80, %c0_81] : memref<1x1x32xf32, #tpu.memory_space<vmem>>, vector<1x1x32xf32>
    %110 = vector.shape_cast %109 : vector<1x1x32xf32> to vector<1x32xf32>
    %c0_82 = arith.constant 0 : index
    %c0_83 = arith.constant 0 : index
    %c0_84 = arith.constant 0 : index
    %111 = vector.load %arg12[%c0_82, %c0_83, %c0_84] : memref<1x1x32xf32, #tpu.memory_space<vmem>>, vector<1x1x32xf32>
    %112 = vector.shape_cast %111 : vector<1x1x32xf32> to vector<1x32xf32>
    %cst_85 = arith.constant dense<0.000000e+00> : vector<8xf32>
    %113 = vector.multi_reduction <add>, %108, %cst_85 [1] : vector<8x32xf32> to vector<8xf32>
    %114 = vector.shape_cast %113 : vector<8xf32> to vector<8x1xf32>
    %cst_86 = arith.constant 3.200000e+01 : f32
    %115 = vector.broadcast %cst_86 : f32 to vector<8x1xf32>
    %116 = arith.divf %114, %115 : vector<8x1xf32>
    %117 = vector.broadcast %116 : vector<8x1xf32> to vector<8x32xf32>
    %118 = arith.subf %108, %117 : vector<8x32xf32>
    %119 = arith.mulf %118, %118 : vector<8x32xf32>
    %cst_87 = arith.constant dense<0.000000e+00> : vector<8xf32>
    %120 = vector.multi_reduction <add>, %119, %cst_87 [1] : vector<8x32xf32> to vector<8xf32>
    %121 = vector.shape_cast %120 : vector<8xf32> to vector<8x1xf32>
    %cst_88 = arith.constant 3.200000e+01 : f32
    %122 = vector.broadcast %cst_88 : f32 to vector<8x1xf32>
    %123 = arith.divf %121, %122 : vector<8x1xf32>
    %cst_89 = arith.constant 9.99999974E-6 : f32
    %124 = vector.broadcast %cst_89 : f32 to vector<8x1xf32>
    %125 = arith.addf %123, %124 : vector<8x1xf32>
    %126 = math.rsqrt %125 : vector<8x1xf32>
    %127 = vector.broadcast %126 : vector<8x1xf32> to vector<8x32xf32>
    %128 = arith.mulf %118, %127 : vector<8x32xf32>
    %129 = vector.broadcast %110 : vector<1x32xf32> to vector<8x32xf32>
    %130 = arith.mulf %128, %129 : vector<8x32xf32>
    %131 = vector.broadcast %112 : vector<1x32xf32> to vector<8x32xf32>
    %132 = arith.addf %130, %131 : vector<8x32xf32>
    %133 = arith.truncf %132 : vector<8x32xf32> to vector<8x32xbf16>
    %c0_90 = arith.constant 0 : index
    %c0_91 = arith.constant 0 : index
    %c0_92 = arith.constant 0 : index
    %134 = vector.load %arg13[%c0_90, %c0_91, %c0_92] : memref<1x32x128xbf16, #tpu.memory_space<vmem>>, vector<1x32x128xbf16>
    %135 = vector.shape_cast %134 : vector<1x32x128xbf16> to vector<32x128xbf16>
    %cst_93 = arith.constant dense<0.000000e+00> : vector<8x128xf32>
    %136 = tpu.matmul %133, %135, %cst_93 {dimension_numbers = #tpu.dot_dimension_numbers<[1], [0], [0], [1], [0, 0, 1, 1], [], []>} : vector<8x32xbf16>, vector<32x128xbf16>, vector<8x128xf32> -> vector<8x128xf32>
    %c0_94 = arith.constant 0 : index
    %c0_95 = arith.constant 0 : index
    %c0_96 = arith.constant 0 : index
    %137 = vector.load %arg14[%c0_94, %c0_95, %c0_96] : memref<1x1x128xf32, #tpu.memory_space<vmem>>, vector<1x1x128xf32>
    %138 = vector.shape_cast %137 : vector<1x1x128xf32> to vector<1x128xf32>
    %139 = vector.broadcast %138 : vector<1x128xf32> to vector<8x128xf32>
    %140 = arith.addf %136, %139 : vector<8x128xf32>
    %cst_97 = arith.constant 0.000000e+00 : f32
    %141 = vector.broadcast %cst_97 : f32 to vector<8x128xf32>
    %142 = arith.maximumf %140, %141 : vector<8x128xf32>
    %143 = arith.truncf %142 : vector<8x128xf32> to vector<8x128xbf16>
    %c0_98 = arith.constant 0 : index
    %c0_99 = arith.constant 0 : index
    %c0_100 = arith.constant 0 : index
    %144 = vector.load %arg15[%c0_98, %c0_99, %c0_100] : memref<1x128x32xbf16, #tpu.memory_space<vmem>>, vector<1x128x32xbf16>
    %145 = vector.shape_cast %144 : vector<1x128x32xbf16> to vector<128x32xbf16>
    %cst_101 = arith.constant dense<0.000000e+00> : vector<8x32xf32>
    %146 = tpu.matmul %143, %145, %cst_101 {dimension_numbers = #tpu.dot_dimension_numbers<[1], [0], [0], [1], [0, 0, 1, 1], [], []>} : vector<8x128xbf16>, vector<128x32xbf16>, vector<8x32xf32> -> vector<8x32xf32>
    %c0_102 = arith.constant 0 : index
    %c0_103 = arith.constant 0 : index
    %c0_104 = arith.constant 0 : index
    %147 = vector.load %arg16[%c0_102, %c0_103, %c0_104] : memref<1x1x32xf32, #tpu.memory_space<vmem>>, vector<1x1x32xf32>
    %148 = vector.shape_cast %147 : vector<1x1x32xf32> to vector<1x32xf32>
    %149 = vector.broadcast %148 : vector<1x32xf32> to vector<8x32xf32>
    %150 = arith.addf %146, %149 : vector<8x32xf32>
    %151 = arith.addf %132, %150 : vector<8x32xf32>
    %c0_105 = arith.constant 0 : index
    %c0_106 = arith.constant 0 : index
    %c0_107 = arith.constant 0 : index
    %152 = vector.load %arg17[%c0_105, %c0_106, %c0_107] : memref<1x1x32xf32, #tpu.memory_space<vmem>>, vector<1x1x32xf32>
    %153 = vector.shape_cast %152 : vector<1x1x32xf32> to vector<1x32xf32>
    %c0_108 = arith.constant 0 : index
    %c0_109 = arith.constant 0 : index
    %c0_110 = arith.constant 0 : index
    %154 = vector.load %arg18[%c0_108, %c0_109, %c0_110] : memref<1x1x32xf32, #tpu.memory_space<vmem>>, vector<1x1x32xf32>
    %155 = vector.shape_cast %154 : vector<1x1x32xf32> to vector<1x32xf32>
    %cst_111 = arith.constant dense<0.000000e+00> : vector<8xf32>
    %156 = vector.multi_reduction <add>, %151, %cst_111 [1] : vector<8x32xf32> to vector<8xf32>
    %157 = vector.shape_cast %156 : vector<8xf32> to vector<8x1xf32>
    %cst_112 = arith.constant 3.200000e+01 : f32
    %158 = vector.broadcast %cst_112 : f32 to vector<8x1xf32>
    %159 = arith.divf %157, %158 : vector<8x1xf32>
    %160 = vector.broadcast %159 : vector<8x1xf32> to vector<8x32xf32>
    %161 = arith.subf %151, %160 : vector<8x32xf32>
    %162 = arith.mulf %161, %161 : vector<8x32xf32>
    %cst_113 = arith.constant dense<0.000000e+00> : vector<8xf32>
    %163 = vector.multi_reduction <add>, %162, %cst_113 [1] : vector<8x32xf32> to vector<8xf32>
    %164 = vector.shape_cast %163 : vector<8xf32> to vector<8x1xf32>
    %cst_114 = arith.constant 3.200000e+01 : f32
    %165 = vector.broadcast %cst_114 : f32 to vector<8x1xf32>
    %166 = arith.divf %164, %165 : vector<8x1xf32>
    %cst_115 = arith.constant 9.99999974E-6 : f32
    %167 = vector.broadcast %cst_115 : f32 to vector<8x1xf32>
    %168 = arith.addf %166, %167 : vector<8x1xf32>
    %169 = math.rsqrt %168 : vector<8x1xf32>
    %170 = vector.broadcast %169 : vector<8x1xf32> to vector<8x32xf32>
    %171 = arith.mulf %161, %170 : vector<8x32xf32>
    %172 = vector.broadcast %153 : vector<1x32xf32> to vector<8x32xf32>
    %173 = arith.mulf %171, %172 : vector<8x32xf32>
    %174 = vector.broadcast %155 : vector<1x32xf32> to vector<8x32xf32>
    %175 = arith.addf %173, %174 : vector<8x32xf32>
    %176 = arith.index_cast %arg1 : i32 to index
    %c0_116 = arith.constant 0 : index
    %c0_117 = arith.constant 0 : index
    %177 = vector.load %arg20[%176, %c0_116, %c0_117] : memref<2x8x32xf32, #tpu.memory_space<vmem>>, vector<1x8x32xf32>
    %178 = vector.shape_cast %177 : vector<1x8x32xf32> to vector<8x32xf32>
    %179 = vector.shape_cast %175 : vector<8x32xf32> to vector<1x8x32xf32>
    tpu.vector_store %arg20[%176, %c0_116, %c0_117], %179 {strides = array<i32>} : memref<2x8x32xf32, #tpu.memory_space<vmem>>, vector<1x8x32xf32>,
    %c1_i32 = arith.constant 1 : i32
    %180 = arith.cmpi eq, %arg0, %c1_i32 : i32
    %181 = arith.extui %180 : i1 to i32
    %c0_i32_118 = arith.constant 0 : i32
    %182 = arith.cmpi ne, %181, %c0_i32_118 : i32
    scf.if %182 {
      %183 = arith.truncf %175 : vector<8x32xf32> to vector<8x32xbf16>
      %184 = arith.index_cast %arg1 : i32 to index
      %c0_119 = arith.constant 0 : index
      %c0_120 = arith.constant 0 : index
      %185 = vector.load %arg19[%184, %c0_119, %c0_120] : memref<2x8x32xbf16, #tpu.memory_space<vmem>>, vector<1x8x32xbf16>
      %186 = vector.shape_cast %185 : vector<1x8x32xbf16> to vector<8x32xbf16>
      %187 = vector.shape_cast %183 : vector<8x32xbf16> to vector<1x8x32xbf16>
      tpu.vector_store %arg19[%184, %c0_119, %c0_120], %187 {strides = array<i32>} : memref<2x8x32xbf16, #tpu.memory_space<vmem>>, vector<1x8x32xbf16>,
    } else {
    }
    return
  }
  func.func @transform_0(%arg0: i32, %arg1: i32) -> (i32, i32, i32) {
    %c0_i32 = arith.constant 0 : i32
    %c0_i32_0 = arith.constant 0 : i32
    %c0_i32_1 = arith.constant 0 : i32
    %c0_i32_2 = arith.constant 0 : i32
    return %c0_i32, %c0_i32_0, %c0_i32_1 : i32, i32, i32
  }
  func.func @transform_1(%arg0: i32, %arg1: i32) -> (i32, i32, i32, i32) {
    %c0_i32 = arith.constant 0 : i32
    %c0_i32_0 = arith.constant 0 : i32
    %c0_i32_1 = arith.constant 0 : i32
    %c0_i32_2 = arith.constant 0 : i32
    return %arg0, %c0_i32, %c0_i32_0, %c0_i32_1 : i32, i32, i32, i32
  }
  func.func @transform_2(%arg0: i32, %arg1: i32) -> (i32, i32, i32, i32) {
    %c0_i32 = arith.constant 0 : i32
    %c0_i32_0 = arith.constant 0 : i32
    %c0_i32_1 = arith.constant 0 : i32
    %c0_i32_2 = arith.constant 0 : i32
    return %arg0, %c0_i32, %c0_i32_0, %c0_i32_1 : i32, i32, i32, i32
  }
  func.func @transform_3(%arg0: i32, %arg1: i32) -> (i32, i32, i32, i32) {
    %c0_i32 = arith.constant 0 : i32
    %c0_i32_0 = arith.constant 0 : i32
    %c0_i32_1 = arith.constant 0 : i32
    %c0_i32_2 = arith.constant 0 : i32
    return %arg0, %c0_i32, %c0_i32_0, %c0_i32_1 : i32, i32, i32, i32
  }
  func.func @transform_4(%arg0: i32, %arg1: i32) -> (i32, i32, i32, i32) {
    %c0_i32 = arith.constant 0 : i32
    %c0_i32_0 = arith.constant 0 : i32
    %c0_i32_1 = arith.constant 0 : i32
    %c0_i32_2 = arith.constant 0 : i32
    return %arg0, %c0_i32, %c0_i32_0, %c0_i32_1 : i32, i32, i32, i32
  }
  func.func @transform_5(%arg0: i32, %arg1: i32) -> (i32, i32, i32, i32) {
    %c0_i32 = arith.constant 0 : i32
    %c0_i32_0 = arith.constant 0 : i32
    %c0_i32_1 = arith.constant 0 : i32
    %c0_i32_2 = arith.constant 0 : i32
    return %arg0, %c0_i32, %c0_i32_0, %c0_i32_1 : i32, i32, i32, i32
  }
  func.func @transform_6(%arg0: i32, %arg1: i32) -> (i32, i32, i32, i32) {
    %c0_i32 = arith.constant 0 : i32
    %c0_i32_0 = arith.constant 0 : i32
    %c0_i32_1 = arith.constant 0 : i32
    %c0_i32_2 = arith.constant 0 : i32
    return %arg0, %c0_i32, %c0_i32_0, %c0_i32_1 : i32, i32, i32, i32
  }
  func.func @transform_7(%arg0: i32, %arg1: i32) -> (i32, i32, i32, i32) {
    %c0_i32 = arith.constant 0 : i32
    %c0_i32_0 = arith.constant 0 : i32
    %c0_i32_1 = arith.constant 0 : i32
    %c0_i32_2 = arith.constant 0 : i32
    return %arg0, %c0_i32, %c0_i32_0, %c0_i32_1 : i32, i32, i32, i32
  }
  func.func @transform_8(%arg0: i32, %arg1: i32) -> (i32, i32, i32) {
    %c0_i32 = arith.constant 0 : i32
    %c0_i32_0 = arith.constant 0 : i32
    %c0_i32_1 = arith.constant 0 : i32
    return %arg0, %c0_i32, %c0_i32_0 : i32, i32, i32
  }
  func.func @transform_9(%arg0: i32, %arg1: i32) -> (i32, i32, i32) {
    %c0_i32 = arith.constant 0 : i32
    %c0_i32_0 = arith.constant 0 : i32
    %c0_i32_1 = arith.constant 0 : i32
    return %arg0, %c0_i32, %c0_i32_0 : i32, i32, i32
  }
  func.func @transform_10(%arg0: i32, %arg1: i32) -> (i32, i32, i32) {
    %c0_i32 = arith.constant 0 : i32
    %c0_i32_0 = arith.constant 0 : i32
    %c0_i32_1 = arith.constant 0 : i32
    return %arg0, %c0_i32, %c0_i32_0 : i32, i32, i32
  }
  func.func @transform_11(%arg0: i32, %arg1: i32) -> (i32, i32, i32) {
    %c0_i32 = arith.constant 0 : i32
    %c0_i32_0 = arith.constant 0 : i32
    %c0_i32_1 = arith.constant 0 : i32
    return %arg0, %c0_i32, %c0_i32_0 : i32, i32, i32
  }
  func.func @transform_12(%arg0: i32, %arg1: i32) -> (i32, i32, i32) {
    %c0_i32 = arith.constant 0 : i32
    %c0_i32_0 = arith.constant 0 : i32
    %c0_i32_1 = arith.constant 0 : i32
    return %arg0, %c0_i32, %c0_i32_0 : i32, i32, i32
  }
  func.func @transform_13(%arg0: i32, %arg1: i32) -> (i32, i32, i32) {
    %c0_i32 = arith.constant 0 : i32
    %c0_i32_0 = arith.constant 0 : i32
    %c0_i32_1 = arith.constant 0 : i32
    return %arg0, %c0_i32, %c0_i32_0 : i32, i32, i32
  }
  func.func @transform_14(%arg0: i32, %arg1: i32) -> (i32, i32, i32) {
    %c0_i32 = arith.constant 0 : i32
    %c0_i32_0 = arith.constant 0 : i32
    %c0_i32_1 = arith.constant 0 : i32
    return %arg0, %c0_i32, %c0_i32_0 : i32, i32, i32
  }
  func.func @transform_15(%arg0: i32, %arg1: i32) -> (i32, i32, i32) {
    %c0_i32 = arith.constant 0 : i32
    %c0_i32_0 = arith.constant 0 : i32
    %c0_i32_1 = arith.constant 0 : i32
    return %arg0, %c0_i32, %c0_i32_0 : i32, i32, i32
  }
  func.func @transform_16(%arg0: i32, %arg1: i32) -> (i32, i32, i32) {
    %c0_i32 = arith.constant 0 : i32
    %c0_i32_0 = arith.constant 0 : i32
    %c0_i32_1 = arith.constant 0 : i32
    return %arg0, %c0_i32, %c0_i32_0 : i32, i32, i32
  }
  func.func @transform_17(%arg0: i32, %arg1: i32) -> (i32, i32, i32) {
    %c0_i32 = arith.constant 0 : i32
    %c0_i32_0 = arith.constant 0 : i32
    %c0_i32_1 = arith.constant 0 : i32
    %c0_i32_2 = arith.constant 0 : i32
    return %c0_i32, %c0_i32_0, %c0_i32_1 : i32, i32, i32
  }
}

</mosaic_0001>

<bundles_post_ra>
// kernel: tpu_custom_call.1
= control target key start
LH: loop header
LB: loop body
LE: loop exit
PB: predicated region body
PF: predicated region fallthrough
CT: control target
= control target key end

     0   :  { %s2310_s0 = inlined_call_operand.vmem [shape: f32[2,8,32], index: 0, kind: input, shape index: {}]   ;;  %s2311_s1 = inlined_call_operand.vmem [shape: bf16[2,2,32,16], index: 1, kind: input, shape index: {}]   ;;  %s2312_s2 = inlined_call_operand.vmem [shape: f32[2,2,1,16], index: 2, kind: input, shape index: {}]   ;;  %s2313_s3 = inlined_call_operand.vmem [shape: bf16[2,2,32,16], index: 3, kind: input, shape index: {}]   ;;  %s2314_s4 = inlined_call_operand.vmem [shape: f32[2,2,1,16], index: 4, kind: input, shape index: {}]   ;;  %s2315_s5 = inlined_call_operand.vmem [shape: bf16[2,2,32,16], index: 5, kind: input, shape index: {}]   ;;  %s2316_s6 = inlined_call_operand.vmem [shape: f32[2,2,1,16], index: 6, kind: input, shape index: {}]   ;;  %s2317_s7 = inlined_call_operand.vmem [shape: bf16[2,2,16,32], index: 7, kind: input, shape index: {}]   ;;  %s2318_s8 = inlined_call_operand.vmem [shape: f32[2,1,32], index: 8, kind: input, shape index: {}]   ;;  %s2319_s9 = inlined_call_operand.vmem [shape: f32[2,1,32], index: 9, kind: input, shape index: {}]   ;;  %s2320_s10 = inlined_call_operand.vmem [shape: f32[2,1,32], index: 10, kind: input, shape index: {}]   ;;  %s2321_s11 = inlined_call_operand.vmem [shape: bf16[2,32,128], index: 11, kind: input, shape index: {}]   ;;  %s2322_s12 = inlined_call_operand.vmem [shape: f32[2,1,128], index: 12, kind: input, shape index: {}]   ;;  %s2323_s13 = inlined_call_operand.vmem [shape: bf16[2,128,32], index: 13, kind: input, shape index: {}]   ;;  %s2324_s14 = inlined_call_operand.vmem [shape: f32[2,1,32], index: 14, kind: input, shape index: {}]   ;;  %s2325_s15 = inlined_call_operand.vmem [shape: f32[2,1,32], index: 15, kind: input, shape index: {}]   ;;  %s2326_s16 = inlined_call_operand.vmem [shape: f32[2,1,32], index: 16, kind: input, shape index: {}]   ;;  %s2327_s17 = inlined_call_operand.hbm [shape: bf16[2,8,32], index: 17, kind: output, shape index: {}]  }
   0x1   :  { %2335 = sst [smem:[#allocation16_spill]] %s2310_s0 }
   0x2   :  { %2336 = sst [smem:[#allocation17_spill]] %s2311_s1 }
   0x3   :  { %2337 = sst [smem:[#allocation18_spill]] %s2312_s2 }
   0x4   :  { %2338 = sst [smem:[#allocation19_spill]] %s2313_s3 }
   0x5   :  { %2339 = sst [smem:[#allocation20_spill]] %s2314_s4 }
   0x6   :  { %2340 = sst [smem:[#allocation21_spill]] %s2315_s5 }
   0x7   :  { %2341 = sst [smem:[#allocation22_spill]] %s2316_s6 }
   0x8   :  { %2342 = sst [smem:[#allocation23_spill]] %s2317_s7 }
   0x9   :  { %2343 = sst [smem:[#allocation24_spill]] %s2321_s11 }
   0xa   :  { %2344 = sst [smem:[#allocation25_spill]] %s2327_s17 }
   0xb   :  { %22 = vsyncpa [#allocation4], 0  ;;  %s2050_s24 = smov 0   ;;  %s2052_s25 = smov 0  }
   0xc   :  { %s2054_s26 = smov 0   ;;  %s2056_s27 = smov 0  }
   0xd   :  { %s2058_s28 = smov 0  }
   0xe LB: > { %2345 = sst [smem:[#allocation6_spill]] %s1938_s24  ;;  %s37_s0 = sadd.s32 1, %s1946_s26  ;;  %s1954_s28 = sphi %s2058_s28, %s28_s28   ;;  %s1950_s27 = sphi %s2056_s27, %s2383_s27   ;;  %s1946_s26 = sphi %s2054_s26, %s2382_s26   ;;  %s1942_s25 = sphi %s2052_s25, %s2381_s25   ;;  %s1938_s24 = sphi %s2050_s24, %s2380_s24  }
   0xf   : > { %2346 = sst [smem:[#allocation7_spill]] %s1942_s25  ;;  %p38_p0 = scmp.ge.s32.totalorder %s37_s0, 2 }
  0x10   : > { %2347 = sst [smem:[#allocation8_spill]] %s1946_s26  ;;  %s40_s30 = sadd.s32 1, %s1950_s27 }
  0x11   : > { %2348 = sst [smem:[#allocation9_spill]] %s1950_s27  ;;  %p1626_p1 = scmp.ge.s32.totalorder %s1954_s28, 1 }
  0x12   : > { %2349 = sst [smem:[#allocation10_spill]] %s1954_s28  ;;  %p628_p2 = scmp.lt.s32.totalorder %s1954_s28, 5 }
  0x13   : > { %s2385_s0 = smov (%p38_p0, %s37_s0), 0  ;;  %s2387_s30 = smov (!%p38_p0, %s40_s30), %s1950_s27 }
  0x14   : > { %2350 = sst [smem:[#allocation11_spill]] %s2385_s0  ;;  %p629_p3 = pnand %p1626_p1, %p628_p2 }
  0x15   : > { %p42_p4 = scmp.ge.s32.totalorder %s2387_s30, 2 }
  0x16   : > { %632 = sbr.rel (%p629_p3) target bundleno = 1835 (0x72b), region = 88 }
  0x17   : > { %s2389_s30 = smov (%p42_p4, %s2387_s30), 0 }
  0x18   : > { %2351 = sst [smem:[#allocation12_spill]] %s2389_s30 }
  0x1b   : > { %p733_p5 = scmp.lt.s32.totalorder %s1942_s25, 1  ;;  %s2352_s22 = sld [smem:[#allocation17_spill]] }
  0x1c   : > { %s2354_s2 = sld [smem:[#allocation18_spill]] }
  0x1d   : > { %s2087_s18 = scalar_select %p733_p5, %s1942_s25, 1 }
  0x1e   : > { %s2356_s3 = sld [smem:[#allocation19_spill]] }
  0x1f   : > { %s1777_s19 = sshll.u32 %s2087_s18, 5  ;;  %s1629_s1 = sshll.u32 %s2087_s18, 1 }
  0x20   : > { %s2358_s4 = sld [smem:[#allocation20_spill]]  ;;  %s789_s20 = scalar_lea.vmem %s2324_s14, %s2087_s18 }
  0x21   : > { %s2094_s23 = scalar_lea.vmem %s2352_s22, %s1777_s19  ;;  %s2359_s5 = sld [smem:[#allocation21_spill]] }
  0x22   : > { %2353 = sst [smem:[#allocation13_spill]] %s2094_s23  ;;  %s2099_s0 = scalar_lea.vmem %s2354_s2, %s1629_s1 }
  0x23   : > { %2355 = sst [smem:[#allocation14_spill]] %s2099_s0  ;;  %s1780_s0 = sshll.u32 %s2087_s18, 4 }
  0x24   : > { %s2104_s17 = scalar_lea.vmem %s2356_s3, %s1777_s19  ;;  %s2360_s6 = sld [smem:[#allocation22_spill]] }
  0x25   : > { %2357 = sst [smem:[#allocation15_spill]] %s2104_s17  ;;  %s1782_s17 = sshll.u32 %s2087_s18, 6 }
  0x26   : > { %s2109_s25 = scalar_lea.vmem %s2358_s4, %s1629_s1  ;;  %s2361_s7 = sld [smem:[#allocation23_spill]] }
  0x27   : > { %s2114_s22 = scalar_lea.vmem %s2359_s5, %s1777_s19  ;;  %s2362_s11 = sld [smem:[#allocation24_spill]] }
  0x28   : > { %s795_s19 = scalar_lea.vmem %s2326_s16, %s2087_s18  ;;  %s2363_s26 = sld [smem:[#allocation7_spill]] }
  0x2a   : > { %s2119_s2 = scalar_lea.vmem %s2360_s6, %s1629_s1  ;;  %s792_s1 = scalar_lea.vmem %s2325_s15, %s2087_s18 }
  0x2c   : > { %s2129_s24 = scalar_lea.vmem %s2361_s7, %s1780_s0  ;;  %s2152_s7 = scalar_lea.vmem %s2323_s13, %s1782_s17 }
  0x2d   : > { %s2142_s5 = scalar_lea.vmem %s2362_s11, %s1780_s0 }
  0x2e   : > { %p1642_p6 = scmp.ne.s32.totalorder %s2363_s26, 0 }
  0x2f   : > { %s2364_s27 = sld [smem:[#allocation6_spill]] (!%p1642_p6) }
  0x30   : > { %800 = sbr.rel (%p1642_p6) target bundleno = 57 (0x39), region = 92  ;;  %s2365_s23 = sld [smem:[#allocation16_spill]] (!%p1642_p6) }
  0x35   : > { %s1643_s3 = sshll.u32 %s2364_s27, 3  ;;  %vm805_vm0 = vcmask 261120  }
  0x36   : > { %s802_s11 = scalar_lea.vmem %s2365_s23, %s1643_s3  ;;  %s804_s4 = scalar_lea.vmem [#allocation2], %s1643_s3 }
  0x37   : > { %v803_v0 = vld [vmem:[%s802_s11] sm:$0xff] }
  0x38   : > { %806 = vst.msk [vmem:[%s804_s4] sm:$0xff] %vm805_vm0, %v803_v0 }
  0x39 PF: > { %s2366_s29 = sld [smem:[#allocation15_spill]]  ;;  %vm831_vm1 = vcmask 261120   ;;  %v1788_v7 = vld [vmem:[%s2114_s22 + $0x8] sm:$0xff]  ;;  %v1787_v8 = vld [vmem:[%s2114_s22] sm:$0xff]  ;;  %vm917_vm2 = vcmask 130048   ;;  %vm957_vm3 = vcmask 1043456   ;;  %v937_v30 = vlaneseq  ;;  %s2371_s30 = scalar_lea.vmem %s2319_s9, %s2087_s18 }
  0x3a   : > { %s2367_s28 = sld [smem:[#allocation13_spill]]  ;;  %v1858_v12 = vld [vmem:[%s2109_s25] ss:$0 sm:$0xff]  ;;  %v1860_v31 = vld [vmem:[%s2109_s25 + $0x1] ss:$0 sm:$0xff]  ;;  %vm943_vm5 = vcmask 64512   ;;  %s2372_s6 = scalar_lea.vmem %s2320_s10, %s2087_s18 }
  0x3b   : > { %s2368_s21 = sld [smem:[#allocation6_spill]]  ;;  %v1859_v24 = vld [vmem:[%s2119_s2] ss:$0 sm:$0xff]  ;;  %v938_v33 = vshrl.u32 %v937_v30, 7  ;;  %v940_v34 = vand.u32 127, %v937_v30  ;;  %v1795_v45 = vld [vmem:[%s2114_s22 + $0x18] sm:$0xff]  ;;  %s2373_s4 = scalar_lea.vmem %s2322_s12, %s2087_s18 }
  0x3c   : > { %s2369_s3 = sld [smem:[#allocation14_spill]]  ;;  %v1794_v47 = vld [vmem:[%s2114_s22 + $0x10] sm:$0xff]  ;;  %v1789_v56 = vld [vmem:[%s2129_s24] sm:$0xff]  ;;  %s2370_s22 = scalar_lea.vmem %s2318_s8, %s2087_s18 }
  0x3d   : > { %vm941_vm4 = vcmp.ge.s32.totalorder %v938_v33, %v940_v34  ;;  %v1862_v58 = vld [vmem:[%s2119_s2 + $0x1] ss:$0 sm:$0xff] }
  0x3f   : > { %v1786_v1 = vld [vmem:[%s2366_s29 + $0x8] sm:$0xff]  ;;  %v1785_v3 = vld [vmem:[%s2366_s29] sm:$0xff]  ;;  %v1793_v9 = vld [vmem:[%s2366_s29 + $0x18] sm:$0xff] }
  0x40   : > { %v1784_v2 = vld [vmem:[%s2367_s28 + $0x8] sm:$0xff]  ;;  %v1783_v4 = vld [vmem:[%s2367_s28] sm:$0xff]  ;;  %874 = vmatpush.bf16.msra.mxu2 %v1786_v1  ;;  %v1792_v10 = vld [vmem:[%s2366_s29 + $0x10] sm:$0xff] }
  0x41   : > { %s1644_s0 = sshll.u32 %s2368_s21, 3  ;;  %841 = vmatpush.bf16.msra.mxu0 %v1784_v2  ;;  %v1791_v22 = vld [vmem:[%s2367_s28 + $0x18] sm:$0xff]  ;;  %v1790_v23 = vld [vmem:[%s2367_s28 + $0x10] sm:$0xff] }
  0x42   : > { %s2176_s11 = scalar_lea.vmem [#allocation2], %s1644_s0  ;;  %v1857_v14 = vld [vmem:[%s2369_s3] ss:$0 sm:$0xff]  ;;  %1007 = vmatpush.bf16.msra.mxu1 %v1791_v22  ;;  %v1861_v53 = vld [vmem:[%s2369_s3 + $0x1] ss:$0 sm:$0xff]  ;;  %s2374_s3 = sld [smem:[#allocation7_spill]] }
  0x43   : > { %v2179_v5 = vld [vmem:[%s2176_s11] sm:$0xff] }
  0x44   : > { %v2183_v6 = vpack.c.bf16 %v2179_v5, %v2179_v5  ;;  %875 = vmatpush.bf16.msra.mxu2 %v1785_v3 }
  0x45   : > { %842 = vmatpush.bf16.msra.mxu0 %v1783_v4 }
  0x46   : > { %1008 = vmatpush.bf16.msra.mxu1 %v1790_v23 }
  0x47   : > { %1662 = vmatmul.msk.bf16.vlgmr.msra.gmra.mxu2 %vm831_vm1, %v2183_v6 }
  0x48   : > { %1653 = vmatmul.msk.bf16.vlgmr.msra.gmra.mxu0 %vm831_vm1, %v2183_v6  ;;  %907 = vmatpush.bf16.msrb.mxu2 %v1788_v7  ;;  %p1771_p7 = scmp.ne.s32.totalorder %s2374_s3, 1 }
  0x49   : > { %1687 = vmatmul.msk.bf16.vlgmr.msra.gmra.mxu1 %vm831_vm1, %v2183_v6  ;;  %s2375_s2 = sld [smem:[#allocation6_spill]] (!%p1771_p7) }
  0x4c   : > { %908 = vmatpush.bf16.msrb.mxu2 %v1787_v8 }
  0x4f   : > { %s1772_s25 = sshll.u32 (!%p1771_p7), %s2375_s2, 2 }
  0x50   : > { %1042 = vmatpush.bf16.msra.mxu2 %v1793_v9 }
  0x54   : > { %1043 = vmatpush.bf16.msra.mxu2 %v1792_v10  ;;  %v1796_v10 = vld [vmem:[%s2129_s24 + $0x8] sm:$0xff] }
  0x57   : > { %1671 = vmatmul.msk.bf16.vlgmr.msrb.gmra.mxu2 %vm831_vm1, %v2183_v6 }
  0x58   : > { %1158 = vmatpush.bf16.msrb.mxu2 %v1796_v10 }
  0x67   : > { %1701 = vmatmul.msk.bf16.vlgmr.msra.gmra.mxu2 %vm831_vm1, %v2183_v6 }
  0xc5   : > { %v844_v11 = vpop.f32.mrf.mxu0 }
  0xc6   : > { %v845_v18 = vadd.f32 %v1857_v14, %v844_v11  ;;  %v1010_v43 = vpop.f32.mrf.mxu1 }
  0xc7   : > { %v1011_v54 = vadd.f32 %v1861_v53, %v1010_v43  ;;  %v1798_v43 = vld [vmem:[%s2142_s5 + $0x8] sm:$0xff] }
  0xc8   : > { %v914_v21 = vpack.c.bf16 %v845_v18, %v845_v18 }
  0xc9   : > { %v1084_v55 = vpack.c.bf16 %v1011_v54, %v1011_v54  ;;  %v1802_v54 = vld [vmem:[%s2152_s7 + $0x18] sm:$0xff] }
  0xca   : > { %v877_v13 = vpop.f32.mrf.mxu2 }
  0xcb   : > { %v878_v15 = vadd.f32 %v1858_v12, %v877_v13 }
  0xcd   : > { %v846_v16 = vpop.f32.mrf.mxu0  ;;  %v916_v17 = vpack.c.bf16 %v878_v15, %v878_v15 }
  0xce   : > { %v1012_v44 = vpop.f32.mrf.mxu1 }
  0xcf   : > { %v922_v19 = vsel %vm917_vm2, %v916_v17, 0  ;;  %v1797_v44 = vld [vmem:[%s2142_s5] sm:$0xff] }
  0xd0   : > { %931 = vmatpush.bf16.xpose.msra.mxu3 %v922_v19 }
  0xd2   : > { %v879_v20 = vpop.f32.mrf.mxu2 }
  0xd7   : > { %1672 = vmatmul.msk.bf16.vlgmr.msra.gmra.mxu3 %vm917_vm2, %v914_v21 }
  0xd8   : > { %1077 = vmatpush.bf16.msrb.mxu3 %v1795_v45  ;;  %v1806_v45 = vld [vmem:[%s2152_s7 + $0x38] sm:$0xff] }
  0xda   : > { %v910_v25 = vpop.f32.mrf.mxu2 }
  0xdb   : > { %v911_v26 = vadd.f32 %v1859_v24, %v910_v25  ;;  %v1863_v25 = vld [vmem:[%s2370_s22] ss:$0 sm:$0xff] }
  0xdc   : > { %1078 = vmatpush.bf16.msrb.mxu3 %v1794_v47 }
  0xdd   : > { %v915_v27 = vpack.c.bf16 %v911_v26, %v911_v26 }
  0xdf   : > { %v959_v28 = vsel %vm957_vm3, %v915_v27, 0 }
  0xe0   : > { %968 = vmatpush.bf16.msrb.mxu0 %v959_v28  ;;  %1180 = vmatpush.bf16.msra.mxu3 %v1789_v56 }
  0xe2   : > { %v912_v29 = vpop.f32.mrf.mxu2 }
  0xe7   : > { %1715 = vmatmul.msk.bf16.vlgmr.msrb.gmra.mxu3 %vm831_vm1, %v2183_v6 }
  0xea   : > { %v1045_v32 = vpop.f32.mrf.mxu2 }
  0xeb   : > { %v1046_v35 = vadd.f32 %v1860_v31, %v1045_v32  ;;  %v1956_v32 = vmov 32.0  }
  0xed   : > { %v1086_v36 = vpack.c.bf16 %v1046_v35, %v1046_v35 }
  0xef   : > { %v1091_v37 = vsel %vm917_vm2, %v1086_v36, 0 }
  0xf0   : > { %1100 = vmatpush.bf16.xpose.msra.mxu0 %v1091_v37 }
  0xf2   : > { %v1047_v40 = vpop.f32.mrf.mxu2 }
 0x15a   : > { %v933_v38 = vpop.f32.mrf.mxu3 }
 0x15b   : > { %v942_v39 = vsel %vm941_vm4, %v933_v38, -1e+09 }
 0x15c   : > { %v944_v41 = vsel %vm943_vm5, %v942_v39, -inf }
 0x15d   : > { %945 = vmax.xlane.f32.xlu0 %v944_v41 }
 0x162   : > { %v935_v42 = vpop.f32.mrf.mxu3 }
 0x16a   : > { %v1080_v59 = vpop.f32.mrf.mxu3 }
 0x16b   : > { %v1081_v62 = vadd.f32 %v1862_v58, %v1080_v59 }
 0x16d   : > { %v1085_v0 = vpack.c.bf16 %v1081_v62, %v1081_v62  ;;  %v1865_v62 = vld [vmem:[%s2372_s6] ss:$0 sm:$0xff] }
 0x16f   : > { %v1121_v2 = vsel %vm957_vm3, %v1085_v0, 0 }
 0x170   : > { %1130 = vmatpush.bf16.msrb.mxu1 %v1121_v2 }
 0x172   : > { %v1082_v3 = vpop.f32.mrf.mxu3 }
 0x173   : > { %v1800_v3 = vld [vmem:[%s2152_s7 + $0x8] sm:$0xff] }
 0x174   : > { %1338 = vmatpush.bf16.msra.mxu1 %v1806_v45 }
 0x1d0   : > { %v946_v46 = vpop.xlane.xlu0 %945 }
 0x1d1   : > { %v947_v48 = vsub.f32 %v942_v39, %v946_v46 }
 0x1d3   : > { %v948_v49 = vmul.f32 1.442695, %v947_v48  ;;  %v1805_v48 = vld [vmem:[%s2152_s7 + $0x30] sm:$0xff] }
 0x1d4   : > { %1339 = vmatpush.bf16.msra.mxu1 %v1805_v48 }
 0x1d5   : > { %1870 = vpow2.f32 %v948_v49 }
 0x1db   : > { %v1871_v50 = vpop.eup %1870 }
 0x1dc   : > { %v950_v51 = vsel %vm943_vm5, %v1871_v50, 0.0  ;;  %v953_v52 = vpack.c.bf16 %v1871_v50, %v1871_v50  ;;  %v1804_v50 = vld [vmem:[%s2152_s7 + $0x28] sm:$0xff] }
 0x1dd   : > { %951 = vadd.xlane.f32.xlu1 %v950_v51  ;;  %1340 = vmatpush.bf16.msra.mxu1 %v1804_v50  ;;  %v1803_v51 = vld [vmem:[%s2152_s7 + $0x20] sm:$0xff] }
 0x1de   : > { %1673 = vmatmul.msk.bf16.vlgmr.msrb.gmra.mxu0 %vm943_vm5, %v953_v52 }
 0x1df   : > { %1261 = vmatpush.bf16.msrb.mxu0 %v1798_v43 }
 0x1e1   : > { %1341 = vmatpush.bf16.msra.mxu1 %v1803_v51 }
 0x1e3   : > { %1262 = vmatpush.bf16.msrb.mxu0 %v1797_v44 }
 0x1e5   : > { %1342 = vmatpush.bf16.msra.mxu1 %v1802_v54 }
 0x1ee   : > { %1716 = vmatmul.msk.bf16.vlgmr.msra.gmra.mxu0 %vm917_vm2, %v1084_v55 }
 0x250   : > { %v952_v57 = vpop.xlane.xlu1 %951 }
 0x251   : > { %1872 = vrcp.f32 %v952_v57  ;;  %v1801_v57 = vld [vmem:[%s2152_s7 + $0x10] sm:$0xff] }
 0x252   : > { %1343 = vmatpush.bf16.msra.mxu1 %v1801_v57 }
 0x256   : > { %1344 = vmatpush.bf16.msra.mxu1 %v1800_v3 }
 0x257   : > { %v1873_v60 = vpop.eup %1872 }
 0x25b   : > { %v970_v61 = vpop.f32.mrf.mxu0 }
 0x25c   : > { %v975_v63 = vmul.f32 %v1873_v60, %v970_v61  ;;  %v1864_v60 = vld [vmem:[%s2371_s30] ss:$0 sm:$0xff] }
 0x25e   : > { %v976_v1 = vpack.c.bf16 %v975_v63, %v975_v63 }
 0x260   : > { %1729 = vmatmul.msk.bf16.vlgmr.msra.gmra.mxu3 %vm917_vm2, %v976_v1 }
 0x263   : > { %v972_v4 = vpop.f32.mrf.mxu0 }
 0x264   : > { %v1799_v4 = vld [vmem:[%s2152_s7] sm:$0xff] }
 0x265   : > { %1345 = vmatpush.bf16.msra.mxu1 %v1799_v4 }
 0x26b   : > { %v1102_v6 = vpop.f32.mrf.mxu0 }
 0x26c   : > { %v1106_v7 = vsel %vm941_vm4, %v1102_v6, -1e+09  ;;  %v1866_v6 = vld [vmem:[%s2373_s4] ss:$0 sm:$0xff] }
 0x26d   : > { %v1107_v8 = vsel %vm943_vm5, %v1106_v7, -inf }
 0x26e   : > { %1108 = vmax.xlane.f32.xlu0 %v1107_v8 }
 0x273   : > { %v1104_v9 = vpop.f32.mrf.mxu0 }
 0x2e1   : > { %v1109_v11 = vpop.xlane.xlu0 %1108 }
 0x2e2   : > { %v1110_v12 = vsub.f32 %v1106_v7, %v1109_v11 }
 0x2e3   : > { %v1182_v13 = vpop.f32.mrf.mxu3 }
 0x2e4   : > { %v1111_v14 = vmul.f32 1.442695, %v1110_v12  ;;  %v1867_v12 = vld [vmem:[%s789_s20] ss:$0 sm:$0xff] }
 0x2e6   : > { %1874 = vpow2.f32 %v1111_v14 }
 0x2eb   : > { %v1184_v15 = vpop.f32.mrf.mxu3 }
 0x2ec   : > { %v1875_v16 = vpop.eup %1874 }
 0x2ed   : > { %v1113_v17 = vsel %vm943_vm5, %v1875_v16, 0.0  ;;  %v1116_v18 = vpack.c.bf16 %v1875_v16, %v1875_v16 }
 0x2ee   : > { %1114 = vadd.xlane.f32.xlu1 %v1113_v17 }
 0x2ef   : > { %1717 = vmatmul.msk.bf16.vlgmr.msrb.gmra.mxu1 %vm943_vm5, %v1116_v18 }
 0x361   : > { %v1115_v19 = vpop.xlane.xlu1 %1114 }
 0x362   : > { %1876 = vrcp.f32 %v1115_v19 }
 0x363   : > { %1878 = vrcp.f32 %v1956_v32  ;;  %v1868_v32 = vld [vmem:[%s792_s1] ss:$0 sm:$0xff]  ;;  %s1391_s1 = scalar_lea.vmem (!%p1771_p7), [#allocation3], %s1772_s25 }
 0x368   : > { %v1877_v20 = vpop.eup %1876 }
 0x369   : > { %v1879_v33 = vpop.eup %1878 }
 0x36a   : > { %v1198_v34 = vmul.f32 32.0, %v1879_v33  ;;  %vm1202_vm6 = vweird.f32 %v1879_v33 }
 0x36c   : > { %v1132_v21 = vpop.f32.mrf.mxu1  ;;  %v1199_v35 = vsub.f32 1.0, %v1198_v34  ;;  %v1869_v34 = vld [vmem:[%s795_s19] ss:$0 sm:$0xff] }
 0x36d   : > { %v1137_v22 = vmul.f32 %v1877_v20, %v1132_v21 }
 0x36e   : > { %v1200_v36 = vmul.f32 %v1879_v33, %v1199_v35 }
 0x36f   : > { %v1138_v23 = vpack.c.bf16 %v1137_v22, %v1137_v22 }
 0x370   : > { %v1201_v37 = vadd.f32 %v1879_v33, %v1200_v36 }
 0x371   : > { %1724 = vmatmul.msk.bf16.vlgmr.msrb.gmra.mxu2 %vm917_vm2, %v1138_v23 }
 0x372   : > { %v2236_v38 = vsel %vm1202_vm6, %v1879_v33, %v1201_v37 }
 0x374   : > { %v1134_v24 = vpop.f32.mrf.mxu1 }
 0x3f4   : > { %v1160_v26 = vpop.f32.mrf.mxu2 }
 0x3f5   : > { %v1183_v27 = vadd.f32 %v1182_v13, %v1160_v26 }
 0x3f7   : > { %v1190_v28 = vadd.f32 %v1863_v25, %v1183_v27 }
 0x3f9   : > { %v1191_v29 = vadd.f32 %v1190_v28, %v2179_v5 }
 0x3fb   : > { %v1194_v30 = vsel %vm831_vm1, %v1191_v29, 0.0 }
 0x3fc   : > { %1195 = vadd.xlane.f32.xlu2 %v1194_v30  ;;  %v1162_v31 = vpop.f32.mrf.mxu2 }
 0x46f   : > { %v1196_v39 = vpop.xlane.xlu2 %1195 }
 0x470   : > { %v1204_v5 = vmul.f32 %v2236_v38, %v1196_v39 }
 0x472   : > { %v1205_v40 = vsub.f32 %v1191_v29, %v1204_v5 }
 0x474   : > { %v1206_v41 = vmul.f32 %v1205_v40, %v1205_v40 }
 0x476   : > { %v1207_v42 = vsel %vm831_vm1, %v1206_v41, 0.0 }
 0x477   : > { %1208 = vadd.xlane.f32.xlu2 %v1207_v42 }
 0x4ea   : > { %v1209_v46 = vpop.xlane.xlu2 %1208 }
 0x4eb   : > { %v1210_v47 = vmul.f32 %v1209_v46, %v2236_v38 }
 0x4ed   : > { %v1211_v49 = vadd.f32 1e-05, %v1210_v47 }
 0x4ef   : > { %1880 = vrsqrt.f32 %v1211_v49  ;;  %vm1218_vm8 = vweird.f32 %v1211_v49 }
 0x4f5   : > { %v1881_v52 = vpop.eup %1880 }
 0x4f6   : > { %v1213_v53 = vmul.f32 %v1881_v52, %v1211_v49  ;;  %vm1219_vm7 = vweird.f32 %v1881_v52 }
 0x4f7   : > { %vm1220_vm9 = vmor %vm1218_vm8, %vm1219_vm7 }
 0x4f8   : > { %v1214_v55 = vmul.f32 %v1881_v52, %v1213_v53 }
 0x4fa   : > { %v1215_v56 = vmul.f32 0.5, %v1214_v55 }
 0x4fc   : > { %v1216_v58 = vsub.f32 1.5, %v1215_v56 }
 0x4fe   : > { %v1217_v59 = vmul.f32 %v1881_v52, %v1216_v58 }
 0x500   : > { %v1221_v61 = vsel %vm1220_vm9, %v1881_v52, %v1217_v59 }
 0x501   : > { %v1222_v63 = vmul.f32 %v1221_v61, %v1205_v40 }
 0x503   : > { %v1226_v0 = vmul.f32 %v1864_v60, %v1222_v63 }
 0x505   : > { %v1230_v1 = vadd.f32 %v1865_v62, %v1226_v0 }
 0x507   : > { %v1231_v2 = vpack.c.bf16 %v1230_v1, %v1230_v1 }
 0x509   : > { %1738 = vmatmul.msk.bf16.vlgmr.msrb.gmra.mxu0 %vm831_vm1, %v1231_v2 }
 0x586   : > { %v1264_v7 = vpop.f32.mrf.mxu0 }
 0x587   : > { %v1265_v8 = vadd.f32 %v1866_v6, %v1264_v7 }
 0x589   : > { %v1268_v9 = vmax.f32 %v1265_v8, 0.0 }
 0x58b   : > { %v1269_v10 = vpack.c.bf16 %v1268_v9, %v1268_v9 }
 0x58d   : > { %1346 = vmatmul.bf16.vlgmr.msra.gmra.mxu1 %v1269_v10 }
 0x58e   : > { %v1266_v11 = vpop.f32.mrf.mxu0 }
 0x60a   : > { %v1347_v13 = vpop.f32.mrf.mxu1 }
 0x60b   : > { %v1348_v14 = vadd.f32 %v1867_v12, %v1347_v13 }
 0x60d   : > { %v1351_v15 = vadd.f32 %v1348_v14, %v1230_v1 }
 0x60f   : > { %v1354_v16 = vsel %vm831_vm1, %v1351_v15, 0.0 }
 0x610   : > { %1355 = vadd.xlane.f32.xlu0 %v1354_v16 }
 0x612   : > { %v1349_v17 = vpop.f32.mrf.mxu1 }
 0x683   : > { %v1356_v18 = vpop.xlane.xlu0 %1355 }
 0x684   : > { %v1357_v19 = vmul.f32 %v1356_v18, %v2236_v38 }
 0x686   : > { %v1358_v20 = vsub.f32 %v1351_v15, %v1357_v19 }
 0x688   : > { %v1359_v21 = vmul.f32 %v1358_v20, %v1358_v20 }
 0x68a   : > { %v1360_v22 = vsel %vm831_vm1, %v1359_v21, 0.0 }
 0x68b   : > { %1361 = vadd.xlane.f32.xlu1 %v1360_v22 }
 0x6fe   : > { %v1362_v23 = vpop.xlane.xlu1 %1361 }
 0x6ff   : > { %v1363_v24 = vmul.f32 %v1362_v23, %v2236_v38 }
 0x701   : > { %v1364_v25 = vadd.f32 1e-05, %v1363_v24 }
 0x703   : > { %1882 = vrsqrt.f32 %v1364_v25  ;;  %vm1371_vm11 = vweird.f32 %v1364_v25 }
 0x709   : > { %v1883_v26 = vpop.eup %1882 }
 0x70a   : > { %v1366_v27 = vmul.f32 %v1883_v26, %v1364_v25  ;;  %vm1372_vm10 = vweird.f32 %v1883_v26 }
 0x70b   : > { %vm1373_vm12 = vmor %vm1371_vm11, %vm1372_vm10 }
 0x70c   : > { %v1367_v28 = vmul.f32 %v1883_v26, %v1366_v27 }
 0x70e   : > { %v1368_v29 = vmul.f32 0.5, %v1367_v28 }
 0x710   : > { %v1369_v30 = vsub.f32 1.5, %v1368_v29 }
 0x712   : > { %v1370_v31 = vmul.f32 %v1883_v26, %v1369_v30 }
 0x714   : > { %v1374_v33 = vsel %vm1373_vm12, %v1883_v26, %v1370_v31 }
 0x715   : > { %v1375_v35 = vmul.f32 %v1374_v33, %v1358_v20 }
 0x717   : > { %v1379_v36 = vmul.f32 %v1868_v32, %v1375_v35  ;;  %1388 = sbr.rel (%p1771_p7) target bundleno = 1823 (0x71f), region = 96 }
 0x719   : > { %v1383_v37 = vadd.f32 %v1869_v34, %v1379_v36 }
 0x71b   : > { %1384 = vst.msk [vmem:[%s2176_s11] sm:$0xff] %vm831_vm1, %v1383_v37 }
 0x71c   : > { %v1389_v38 = vpack.c.bf16 %v1383_v37, %v1383_v37  ;;  %vm1392_vm13 = vcmask 257024  }
 0x71e   : > { %1393 = vst.msk [vmem:[%s1391_s1] sm:$0xf] %vm1392_vm13, %v1389_v38 }
 0x71f PF: > { %s2376_s22 = sld [smem:[#allocation10_spill]]  ;;  %s1957_s26 = smov [#allocation3]  }
 0x720   : > { %s2378_s24 = sld [smem:[#allocation25_spill]]  ;;  %s1399_s27 = sshll.u32 %s1957_s26, 4  ;;  %s1400_s27 = int_to_ptr.vmem [resolvable:$true] %s1399_s27 }
 0x721   : > { %s1958_s11 = smov 64   ;;  %s1959_s6 = smov 4  }
 0x725   : > { %s2377_s5 = sadd.s32 4294967295, %s2376_s22  }
 0x726   : > { %p1811_p8 = scmp.eq.s32.totalorder %s2377_s5, 3  ;;  %s1401_s30 = sshll.u32 %s2378_s24, 4  ;;  %s1402_s30 = int_to_ptr.hbm [resolvable:$true] %s1401_s30 }
 0x728   : > { %1808 = dma.vmem_to_hbm [thread:$0]  (%p1811_p8), %s1400_s27, 128, %s1402_s30, [#allocation4], %s1958_s11, %s1958_s11, %s1959_s6  }
 0x729   : > { %1933 = dma.done.wait (%p1811_p8), [#allocation4], 128  }
 0x72a   : > { %1935 = vsyncadd (%p1811_p8), [#allocation4], 4294967168 }
 0x72b PF: > { %s2379_s17 = sld [smem:[#allocation10_spill]] }
 0x72c   : > { %s2380_s24 = sld [smem:[#allocation8_spill]] }
 0x72d   : > { %s2381_s25 = sld [smem:[#allocation9_spill]] }
 0x72e   : > { %s2382_s26 = sld [smem:[#allocation11_spill]] }
 0x72f   : > { %s2383_s27 = sld [smem:[#allocation12_spill]] }
 0x731   : > { %s28_s28 = sadd.s32 1, %s2379_s17  }
 0x732   : > { %p25_p9 = scmp.ge.s32.totalorder %s28_s28, 6  }
 0x734   :  { %27 = sbr.rel (!%p25_p9) target bundleno = 14 (0xe), region = 179 }
 0x739   :  { %1418 = vsyncpa [#allocation4], 1 }
 0x73a   :  { %1420 = vsyncpa [#allocation4 + $0x1], 1 }

</bundles_post_ra>
